<compile_context>
chip_gen: v6e
topology: v6e:2x2x1
jax: 0.10.0
libtpu: 0.0.40
codegen_flags: <defaults>
</compile_context>

<pallas_src>
import functools

import jax
import jax.numpy as jnp
from jax.experimental import pallas as pl
from jax.experimental.pallas import tpu as pltpu


# ----------------------------------------------------------------------------
# Kernel bodies
# ----------------------------------------------------------------------------
def _attn_tile(q_ref, k_ref, v_ref, mask_ref, out_ref, inv_temp, inf_val):
    # Per-grid-step ref shapes (Bt = batch tile):
    #   q_ref:    (Bt, d_k)
    #   k_ref:    (Bt, L, d_k)
    #   v_ref:    (Bt, L, d_v)
    #   mask_ref: (Bt, L) integer, nonzero = masked  (or None)
    #   out_ref:  (Bt, d_v)
    q = q_ref[...]                                   # native dtype (bf16 stays bf16)
    k = k_ref[...]

    # scores[b, l] = <k[b, l, :], q[b, :]> * inv_temp
    # M=1 matvec would waste the MXU; VPU broadcast-mul + reduce, f32 accumulate.
    prod = k * q[:, None, :]                         # (Bt, L, d_k), input dtype
    scores = jnp.sum(prod, axis=-1, dtype=jnp.float32) * inv_temp   # (Bt, L) f32

    # masked_fill_(attn_mask, -hparams.inf): any nonzero mask value masks.
    if mask_ref is not None:
        scores = jnp.where(mask_ref[...] != 0, jnp.float32(-inf_val), scores)

    # softmax over L
    m = jnp.max(scores, axis=-1, keepdims=True)
    p = jnp.exp(scores - m)
    s = jnp.sum(p, axis=-1, keepdims=True)
    w = p * pl.reciprocal(s, approx=True)            # s >= 1, EUP approx recip is safe

    # dropout: eval-mode identity.

    # ctx[b, :] = sum_l w[b, l] * v[b, l, :] — broadcast-mul + sublane reduce,
    # multiply in V's dtype (bf16-native on v6e/v7x), accumulate in f32.
    v = v_ref[...]
    ctx = jnp.sum(w.astype(v.dtype)[:, :, None] * v, axis=1, dtype=jnp.float32)
    out_ref[...] = ctx.astype(out_ref.dtype)


def _attn_kernel_masked(q_ref, k_ref, v_ref, mask_ref, out_ref, *, inv_temp, inf_val):
    _attn_tile(q_ref, k_ref, v_ref, mask_ref, out_ref, inv_temp, inf_val)


def _attn_kernel_nomask(q_ref, k_ref, v_ref, out_ref, *, inv_temp):
    _attn_tile(q_ref, k_ref, v_ref, None, out_ref, inv_temp, 0.0)


# ----------------------------------------------------------------------------
# Tile-size / VMEM budgeting
# ----------------------------------------------------------------------------
def _round_up(x, m):
    return ((x + m - 1) // m) * m


def _vmem_limit_bytes():
    """Per-generation VMEM limit with headroom (v5e/v6e: 128 MiB, v7x: 64 MiB)."""
    try:
        cap = int(pltpu.get_tpu_info().vmem_capacity_bytes)
    except Exception:
        cap = 64 << 20          # conservative fallback: v7x per-TensorCore VMEM
    return (cap * 3) // 4       # leave headroom for compiler temporaries


def _choose_batch_tile(B_pad, len_k, d_k, d_v, kv_itemsize, tile_budget_bytes):
    """Largest multiple-of-8 Bt whose double-buffered tiles fit the VMEM budget,
    while keeping >=2 grid steps (megacore / pipelining) when the batch allows."""
    # Padded (sublane x lane) per-batch-row VMEM footprint, double-buffered.
    lk_sub = _round_up(len_k, 8)
    d_pads = _round_up(d_k, 128) + _round_up(d_v, 128)
    row_vmem = 2 * lk_sub * d_pads * kv_itemsize          # K + V tiles, x2 buffers
    row_vmem += 2 * d_pads * 4                            # q + out rows (f32 worst case)
    row_vmem += 2 * _round_up(len_k, 128) * 4             # mask row (int32 worst case)

    bt = max(8, (tile_budget_bytes // max(row_vmem, 1)) // 8 * 8)   # hard VMEM cap
    bt = min(bt, 1024, max(_round_up(B_pad, 8), 8))

    # Per-step K+V HBM traffic floor (~1 MiB) to amortize ~0.35 us/step overhead
    # is satisfied automatically by taking the largest Bt allowed above; only
    # shrink to expose >=2 grid steps when there is enough batch to share.
    if B_pad >= 16 and bt >= B_pad:
        bt = max(8, _round_up(-(-B_pad // 2), 8))
    return bt


# ----------------------------------------------------------------------------
# Public wrapper
# ----------------------------------------------------------------------------
def dot_prod_attn(q, k, v, attn_mask=None, *, d_model, inf_val=1e9):
    """q: [B, d_q], k: [B, len_k, d_k], v: [B, len_v, d_v],
    attn_mask: [B, len_k] (any nonzero / True = masked) or None."""
    B, d_q = q.shape
    Bk, len_k, d_k = k.shape
    Bv, len_v, d_v = v.shape
    assert d_k == d_q and len_k == len_v and B == Bk == Bv

    inv_temp = 1.0 / (float(d_model) ** 0.5)
    kv_itemsize = jnp.dtype(k.dtype).itemsize

    vmem_limit = _vmem_limit_bytes()
    B_pad = _round_up(B, 8)
    Bt = _choose_batch_tile(B_pad, len_k, d_k, d_v, kv_itemsize, vmem_limit // 2)
    grid = (pl.cdiv(B_pad, Bt),)

    # Accept bool / int8 / int32 masks as-is (no widening re-cast in the
    # wrapper); only normalize bool -> int8 (same byte width, safer lowering).
    if attn_mask is not None and attn_mask.dtype == jnp.bool_:
        attn_mask = attn_mask.astype(jnp.int8)

    # Pad batch to a multiple of 8 (zero rows -> uniform softmax, finite, sliced off).
    pad = B_pad - B
    if pad:
        q = jnp.pad(q, ((0, pad), (0, 0)))
        k = jnp.pad(k, ((0, pad), (0, 0), (0, 0)))
        v = jnp.pad(v, ((0, pad), (0, 0), (0, 0)))
        if attn_mask is not None:
            attn_mask = jnp.pad(attn_mask, ((0, pad), (0, 0)))

    q_spec = pl.BlockSpec((Bt, d_q), lambda b: (b, 0))
    k_spec = pl.BlockSpec((Bt, len_k, d_k), lambda b: (b, 0, 0))
    v_spec = pl.BlockSpec((Bt, len_v, d_v), lambda b: (b, 0, 0))
    out_spec = pl.BlockSpec((Bt, d_v), lambda b: (b, 0))

    if attn_mask is not None:
        kernel = functools.partial(
            _attn_kernel_masked, inv_temp=inv_temp, inf_val=float(inf_val))
        in_specs = [q_spec, k_spec, v_spec,
                    pl.BlockSpec((Bt, len_k), lambda b: (b, 0))]
        args = (q, k, v, attn_mask)
        mask_bytes = B * len_k * jnp.dtype(attn_mask.dtype).itemsize
    else:
        kernel = functools.partial(_attn_kernel_nomask, inv_temp=inv_temp)
        in_specs = [q_spec, k_spec, v_spec]
        args = (q, k, v)
        mask_bytes = 0

    out_itemsize = jnp.dtype(q.dtype).itemsize
    cost = pl.CostEstimate(
        flops=int(2 * B * len_k * (d_k + d_v) + 4 * B * len_k),
        transcendentals=int(B * len_k + B),
        bytes_accessed=int(B * d_q * out_itemsize
                           + B * len_k * d_k * kv_itemsize
                           + B * len_v * d_v * jnp.dtype(v.dtype).itemsize
                           + B * d_v * out_itemsize
                           + mask_bytes),
    )

    out = pl.pallas_call(
        kernel,
        out_shape=jax.ShapeDtypeStruct((B_pad, d_v), q.dtype),
        grid_spec=pltpu.PrefetchScalarGridSpec(
            num_scalar_prefetch=0,
            grid=grid,
            in_specs=in_specs,
            out_specs=out_spec,
        ),
        compiler_params=pltpu.CompilerParams(
            dimension_semantics=("parallel",),
            vmem_limit_bytes=int(vmem_limit),
        ),
        cost_estimate=cost,
    )(*args)
    return out[:B] if pad else out


# ----------------------------------------------------------------------------
# Reference + self-test
# ----------------------------------------------------------------------------
def _reference(q, k, v, mask, d_model, inf_val):
    temp = float(d_model) ** 0.5
    scores = jnp.einsum("bld,bd->bl", k.astype(jnp.float32),
                        q.astype(jnp.float32)) / temp
    if mask is not None:
        scores = jnp.where(mask != 0, -inf_val, scores)
    w = jax.nn.softmax(scores, axis=-1)
    return jnp.einsum("bl,bld->bd", w, v.astype(jnp.float32))


if __name__ == "__main__":
    # hparams: d_model = 32, dropout = 0.0 (eval), inf = 1e9
    B, len_k, d_model, d_v = 2, 8, 32, 32

    key = jax.random.PRNGKey(0)
    kq, kk, kv = jax.random.split(key, 3)
    q = jax.random.normal(kq, (B, d_model), dtype=jnp.float32)
    k = jax.random.normal(kk, (B, len_k, d_model), dtype=jnp.float32)
    v = jax.random.normal(kv, (B, len_k, d_v), dtype=jnp.float32)
    # mask out the last two source positions of batch element 1
    attn_mask = jnp.zeros((B, len_k), dtype=jnp.int32).at[1, -2:].set(1)

    # masked, f32
    ctx = dot_prod_attn(q, k, v, attn_mask, d_model=d_model, inf_val=1e9)
    ctx = jax.block_until_ready(ctx)
    ref = _reference(q, k, v, attn_mask, d_model, 1e9)
    assert ctx.shape == (B, d_v)
    # tolerance covers the EUP approximate-reciprocal softmax normalization
    assert jnp.allclose(ctx, ref, atol=2e-3, rtol=2e-3), "masked f32 mismatch"

    # no-mask specialization (no mask stream DMA)
    ctx_nm = jax.block_until_ready(dot_prod_attn(q, k, v, None, d_model=d_model))
    ref_nm = _reference(q, k, v, None, d_model, 1e9)
    assert jnp.allclose(ctx_nm, ref_nm, atol=2e-3, rtol=2e-3), "no-mask mismatch"

    # bf16 K/V/Q path (native bf16 VALU on v6e/v7x, f32 accumulation)
    qb, kb, vb = (x.astype(jnp.bfloat16) for x in (q, k, v))
    ctx_bf = jax.block_until_ready(
        dot_prod_attn(qb, kb, vb, attn_mask, d_model=d_model, inf_val=1e9))
    ref_bf = _reference(qb, kb, vb, attn_mask, d_model, 1e9)
    assert jnp.allclose(ctx_bf.astype(jnp.float32), ref_bf,
                        atol=5e-2, rtol=5e-2), "bf16 mismatch"

    print("KERNEL_OK")
</pallas_src>

<mosaic_0001>
module attributes {stable_mosaic.version = 11 : i64} {
  func.func @_attn_kernel_masked(%arg0: i32, %arg1: memref<8x32xf32, #tpu.memory_space<vmem>>, %arg2: memref<8x8x32xf32, #tpu.memory_space<vmem>>, %arg3: memref<8x8x32xf32, #tpu.memory_space<vmem>>, %arg4: memref<8x8xi32, #tpu.memory_space<vmem>>, %arg5: memref<8x32xf32, #tpu.memory_space<vmem>>) attributes {dimension_semantics = [#tpu.dimension_semantics<parallel>], iteration_bounds = array<i64: 1>, scalar_prefetch = 0 : i64, scratch_operands = 0 : i64, tpu.core_type = #tpu.core_type<tc>, window_params = [{transform_indices = @transform_0, window_bounds = array<i64: 8, 32>}, {transform_indices = @transform_1, window_bounds = array<i64: 8, 8, 32>}, {transform_indices = @transform_2, window_bounds = array<i64: 8, 8, 32>}, {transform_indices = @transform_3, window_bounds = array<i64: 8, 8>}, {transform_indices = @transform_4, window_bounds = array<i64: 8, 32>}]} {
    %c0 = arith.constant 0 : index
    %c0_0 = arith.constant 0 : index
    %0 = vector.load %arg1[%c0, %c0_0] : memref<8x32xf32, #tpu.memory_space<vmem>>, vector<8x32xf32>
    %c0_1 = arith.constant 0 : index
    %c0_2 = arith.constant 0 : index
    %c0_3 = arith.constant 0 : index
    %1 = vector.load %arg2[%c0_1, %c0_2, %c0_3] : memref<8x8x32xf32, #tpu.memory_space<vmem>>, vector<8x8x32xf32>
    %2 = vector.shape_cast %0 : vector<8x32xf32> to vector<8x1x32xf32>
    %3 = vector.broadcast %2 : vector<8x1x32xf32> to vector<8x8x32xf32>
    %4 = arith.mulf %1, %3 : vector<8x8x32xf32>
    %cst = arith.constant dense<0.000000e+00> : vector<8x8xf32>
    %5 = vector.multi_reduction <add>, %4, %cst [2] : vector<8x8x32xf32> to vector<8x8xf32>
    %cst_4 = arith.constant 0.176776692 : f32
    %6 = vector.broadcast %cst_4 : f32 to vector<8x8xf32>
    %7 = arith.mulf %5, %6 : vector<8x8xf32>
    %c0_5 = arith.constant 0 : index
    %c0_6 = arith.constant 0 : index
    %8 = vector.load %arg4[%c0_5, %c0_6] : memref<8x8xi32, #tpu.memory_space<vmem>>, vector<8x8xi32>
    %c0_i32 = arith.constant 0 : i32
    %9 = vector.broadcast %c0_i32 : i32 to vector<8x8xi32>
    %10 = arith.cmpi ne, %8, %9 : vector<8x8xi32>
    %cst_7 = arith.constant -1.000000e+09 : f32
    %11 = vector.broadcast %cst_7 : f32 to vector<8x8xf32>
    %12 = arith.select %10, %11, %7 : vector<8x8xi1>, vector<8x8xf32>
    %cst_8 = arith.constant dense<0xFF800000> : vector<8xf32>
    %13 = vector.multi_reduction <maximumf>, %12, %cst_8 [1] : vector<8x8xf32> to vector<8xf32>
    %14 = vector.shape_cast %13 : vector<8xf32> to vector<8x1xf32>
    %15 = vector.broadcast %14 : vector<8x1xf32> to vector<8x8xf32>
    %16 = arith.subf %12, %15 : vector<8x8xf32>
    %17 = math.exp %16 : vector<8x8xf32>
    %cst_9 = arith.constant dense<0.000000e+00> : vector<8xf32>
    %18 = vector.multi_reduction <add>, %17, %cst_9 [1] : vector<8x8xf32> to vector<8xf32>
    %19 = vector.shape_cast %18 : vector<8xf32> to vector<8x1xf32>
    %20 = tpu.reciprocal %19 {approx = true} : vector<8x1xf32> -> vector<8x1xf32>
    %21 = vector.broadcast %20 : vector<8x1xf32> to vector<8x8xf32>
    %22 = arith.mulf %17, %21 : vector<8x8xf32>
    %c0_10 = arith.constant 0 : index
    %c0_11 = arith.constant 0 : index
    %c0_12 = arith.constant 0 : index
    %23 = vector.load %arg3[%c0_10, %c0_11, %c0_12] : memref<8x8x32xf32, #tpu.memory_space<vmem>>, vector<8x8x32xf32>
    %24 = vector.shape_cast %22 : vector<8x8xf32> to vector<8x8x1xf32>
    %25 = vector.broadcast %24 : vector<8x8x1xf32> to vector<8x8x32xf32>
    %26 = arith.mulf %25, %23 : vector<8x8x32xf32>
    %cst_13 = arith.constant dense<0.000000e+00> : vector<8x32xf32>
    %27 = vector.multi_reduction <add>, %26, %cst_13 [1] : vector<8x8x32xf32> to vector<8x32xf32>
    %c0_14 = arith.constant 0 : index
    %c0_15 = arith.constant 0 : index
    %28 = vector.load %arg5[%c0_14, %c0_15] : memref<8x32xf32, #tpu.memory_space<vmem>>, vector<8x32xf32>
    tpu.vector_store %arg5[%c0_14, %c0_15], %27 {strides = array<i32>} : memref<8x32xf32, #tpu.memory_space<vmem>>, vector<8x32xf32>,
    return
  }
  func.func @transform_0(%arg0: i32) -> (i32, i32) {
    %c0_i32 = arith.constant 0 : i32
    %c0_i32_0 = arith.constant 0 : i32
    return %arg0, %c0_i32 : i32, i32
  }
  func.func @transform_1(%arg0: i32) -> (i32, i32, i32) {
    %c0_i32 = arith.constant 0 : i32
    %c0_i32_0 = arith.constant 0 : i32
    %c0_i32_1 = arith.constant 0 : i32
    return %arg0, %c0_i32, %c0_i32_0 : i32, i32, i32
  }
  func.func @transform_2(%arg0: i32) -> (i32, i32, i32) {
    %c0_i32 = arith.constant 0 : i32
    %c0_i32_0 = arith.constant 0 : i32
    %c0_i32_1 = arith.constant 0 : i32
    return %arg0, %c0_i32, %c0_i32_0 : i32, i32, i32
  }
  func.func @transform_3(%arg0: i32) -> (i32, i32) {
    %c0_i32 = arith.constant 0 : i32
    %c0_i32_0 = arith.constant 0 : i32
    return %arg0, %c0_i32 : i32, i32
  }
  func.func @transform_4(%arg0: i32) -> (i32, i32) {
    %c0_i32 = arith.constant 0 : i32
    %c0_i32_0 = arith.constant 0 : i32
    return %arg0, %c0_i32 : i32, i32
  }
}

</mosaic_0001>

<bundles_post_ra>
// kernel: tpu_custom_call.1
= control target key start
LH: loop header
LB: loop body
LE: loop exit
PB: predicated region body
PF: predicated region fallthrough
CT: control target
= control target key end

     0   :  { %9 = vsyncpa [#allocation3], 0  ;;  %s666_s0 = inlined_call_operand.hbm [shape: f32[8,32], index: 0, kind: input, shape index: {}]   ;;  %s667_s1 = inlined_call_operand.hbm [shape: f32[8,8,32], index: 1, kind: input, shape index: {}]   ;;  %s668_s2 = inlined_call_operand.hbm [shape: f32[8,8,32], index: 2, kind: input, shape index: {}]   ;;  %s669_s3 = inlined_call_operand.hbm [shape: s32[8,8], index: 3, kind: input, shape index: {}]   ;;  %s670_s4 = inlined_call_operand.hbm [shape: f32[8,32], index: 4, kind: output, shape index: {}]  }
   0x1   :  { %10 = vsyncpa [#allocation6], 0 }
   0x2   :  { %11 = vsyncpa [#allocation9], 0 }
   0x3   :  { %12 = vsyncpa [#allocation4], 0  ;;  %s564_s15 = smov [#allocation5]  }
   0x4   :  { %s28_s16 = sshll.u32 %s564_s15, 4  ;;  %s29_s16 = int_to_ptr.vmem [resolvable:$true] %s28_s16 }
   0x5   :  { %s464_s17 = scalar_lea.vmem %s29_s16, 1024  ;;  %p469_p1 = scmp.lt.s32.totalorder %s29_s16, %s29_s16 }
   0x6   :  { %p465_p0 = scmp.ne.s32.totalorder %s29_s16, %s464_s17  ;;  %p470_p2 = scmp.lt.s32.totalorder %s464_s17, %s464_s17 }
   0x8   :  { %p471_p3 = por %p470_p2, %p469_p1 }
   0xa   :  { %p472_p4 = pnand %p471_p3, %p465_p0 }
   0xc   :  { %475 = shalt.err (!%p472_p4)
}
   0xd   :  { %s565_s18 = smov 128   ;;  %s566_s19 = smov 8  }
   0xe   :  { %34 = dma.hbm_to_vmem [thread:$0]  %s667_s1, 1024, %s29_s16, [#allocation6], %s565_s18, %s565_s18, %s566_s19  }
   0xf   :  { %s567_s22 = smov [#allocation2]   ;;  %s568_s24 = smov [#allocation7]  }
  0x10   :  { %s19_s23 = sshll.u32 %s567_s22, 4  ;;  %s40_s25 = sshll.u32 %s568_s24, 4  ;;  %s20_s23 = int_to_ptr.vmem [resolvable:$true] %s19_s23  ;;  %s41_s25 = int_to_ptr.vmem [resolvable:$true] %s40_s25 }
  0x11   :  { %s484_s26 = scalar_lea.vmem %s20_s23, 128  ;;  %p489_p6 = scmp.lt.s32.totalorder %s20_s23, %s20_s23 }
  0x12   :  { %p485_p5 = scmp.ne.s32.totalorder %s20_s23, %s484_s26  ;;  %p490_p7 = scmp.lt.s32.totalorder %s484_s26, %s484_s26 }
  0x14   :  { %p491_p8 = por %p490_p7, %p489_p6 }
  0x16   :  { %p492_p9 = pnand %p491_p8, %p485_p5 }
  0x18   :  { %495 = shalt.err (!%p492_p9)
}
  0x19   :  { %22 = dma.hbm_to_vmem [thread:$0]  %s666_s0, 128, %s20_s23, [#allocation3]  }
  0x1a   :  { %s504_s29 = scalar_lea.vmem %s41_s25, 1024  ;;  %p509_p11 = scmp.lt.s32.totalorder %s41_s25, %s41_s25 }
  0x1b   :  { %p505_p10 = scmp.ne.s32.totalorder %s41_s25, %s504_s29  ;;  %p510_p12 = scmp.lt.s32.totalorder %s504_s29, %s504_s29 }
  0x1d   :  { %p511_p13 = por %p510_p12, %p509_p11 }
  0x1f   :  { %p512_p0 = pnand %p511_p13, %p505_p10 }
  0x21   :  { %515 = shalt.err (!%p512_p0)
}
  0x22   :  { %46 = dma.hbm_to_vmem [thread:$0]  %s668_s2, 1024, %s41_s25, [#allocation6], %s565_s18, %s565_s18, %s566_s19  }
  0x23   :  { %s569_s5 = smov [#allocation8]  }
  0x24   :  { %s53_s6 = sshll.u32 %s569_s5, 4  ;;  %s54_s6 = int_to_ptr.vmem [resolvable:$true] %s53_s6 }
  0x25   :  { %s524_s7 = scalar_lea.vmem %s54_s6, 128  ;;  %p529_p2 = scmp.lt.s32.totalorder %s54_s6, %s54_s6 }
  0x26   :  { %p525_p1 = scmp.ne.s32.totalorder %s54_s6, %s524_s7  ;;  %p530_p3 = scmp.lt.s32.totalorder %s524_s7, %s524_s7 }
  0x28   :  { %p531_p4 = por %p530_p3, %p529_p2 }
  0x2a   :  { %p532_p5 = pnand %p531_p4, %p525_p1 }
  0x2c   :  { %535 = shalt.err (!%p532_p5)
}
  0x2d   :  { %56 = dma.hbm_to_vmem [thread:$0]  %s669_s3, 128, %s54_s6, [#allocation9]  }
  0x2e   :  { %556 = dma.done.wait [#allocation3], 128  }
  0x2f   :  { %557 = vsyncadd [#allocation3], 4294967168 }
  0x30   :  { %558 = dma.done.wait [#allocation6], 2048  }
  0x31   :  { %559 = vsyncadd [#allocation6], 4294965248 }
  0x32   :  { %560 = dma.done.wait [#allocation9], 128  }
  0x33   :  { %561 = vsyncadd [#allocation9], 4294967168  ;;  %v83_v0 = vlaneseq  ;;  %v570_v1 = vmov 1966171168   ;;  %v69_v6 = vld [vmem:[#allocation2] sm:$0xff]  ;;  %v70_v13 = vld [vmem:[#allocation5] sm:$0xff] }
  0x34   :  { %v81_v2 = vunpack.c.l.s4 %v570_v1  ;;  %v79_v9 = vcombine.high %v69_v6, %v69_v6  ;;  %vm176_vm0 = vcmask 261120   ;;  %v72_v18 = vld [vmem:[#allocation5 + $0x10] sm:$0xff]  ;;  %v71_v19 = vld [vmem:[#allocation5 + $0x8] sm:$0xff]  ;;  %v74_v25 = vld [vmem:[#allocation5 + $0x20] sm:$0xff]  ;;  %vm253_vm1 = vcmask 1041409   ;;  %s571_s2 = smov [#allocation10]  }
  0x35   :  { %v609_v3 = vshrl.u32 %v83_v0, 7  ;;  %v73_v26 = vld [vmem:[#allocation5 + $0x18] sm:$0xff]  ;;  %v75_v35 = vld [vmem:[#allocation5 + $0x28] sm:$0xff]  ;;  %v76_v42 = vld [vmem:[#allocation5 + $0x30] sm:$0xff]  ;;  %v220_v53 = vand.u32 127, %v83_v0  ;;  %vm255_vm2 = vcmask 1042434  }
  0x36   :  { %v82_v4 = vunpack.c.0.s8 %v81_v2  ;;  %v77_v46 = vld [vmem:[#allocation5 + $0x38] sm:$0xff]  ;;  %vm257_vm3 = vcmask 1043459   ;;  %vm259_vm4 = vcmask 1044484   ;;  %vm261_vm5 = vcmask 1045509   ;;  %s432_s3 = sshll.u32 %s571_s2, 4  ;;  %s433_s3 = int_to_ptr.vmem [resolvable:$true] %s432_s3 }
  0x37   :  { %v613_v8 = vsub.s32 0, %v609_v3  ;;  %v223_v56 = vsub.s32 %v220_v53, %v609_v3  ;;  %vm263_vm6 = vcmask 1046534   ;;  %vm265_vm7 = vcmask 1047559   ;;  %s536_s9 = scalar_lea.vmem %s433_s3, 128  ;;  %p541_p7 = scmp.lt.s32.totalorder %s433_s3, %s433_s3 }
  0x38   :  { %v85_v5 = vsub.s32 %v82_v4, %v609_v3  ;;  %vm269_vm9 = vcmask 64512   ;;  %p537_p6 = scmp.ne.s32.totalorder %s433_s3, %s536_s9  ;;  %p542_p8 = scmp.lt.s32.totalorder %s536_s9, %s536_s9 }
  0x3a   :  { %v86_v7 = vrot.slane %v69_v6, %v85_v5  ;;  %v93_v12 = vrot.slane %v79_v9, %v85_v5  ;;  %p543_p9 = por %p542_p8, %p541_p7 }
  0x3c   :  { %v102_v10 = vrot.slane %v86_v7, %v85_v5  ;;  %v94_v11 = vcombine.high %v86_v7, %v86_v7  ;;  %v109_v17 = vrot.slane %v93_v12, %v85_v5  ;;  %v95_v20 = vcombine.high %v93_v12, %v93_v12  ;;  %p544_p10 = pnand %p543_p9, %p537_p6 }
  0x3e   :  { %v131_v14 = vrot.slane %v102_v10, %v613_v8  ;;  %v124_v15 = vcombine.high %v102_v10, %v102_v10  ;;  %v116_v16 = vrot.slane %v94_v11, %v85_v5  ;;  %v147_v27 = vrot.slane %v109_v17, %v613_v8 }
  0x3f   :  { %v123_v28 = vrot.slane %v95_v20, %v85_v5  ;;  %v125_v29 = vcombine.high %v109_v17, %v109_v17 }
  0x40   :  { %v168_v21 = vmul.f32 %v131_v14, %v70_v13  ;;  %v139_v22 = vrot.slane %v124_v15, %v613_v8  ;;  %v135_v23 = vrot.slane %v116_v16, %v613_v8  ;;  %v126_v24 = vcombine.high %v116_v16, %v116_v16 }
  0x41   :  { %v172_v34 = vmul.f32 %v147_v27, %v74_v25  ;;  %v151_v36 = vrot.slane %v123_v28, %v613_v8  ;;  %v127_v37 = vcombine.high %v123_v28, %v123_v28  ;;  %v155_v41 = vrot.slane %v125_v29, %v613_v8 }
  0x42   :  { %v177_v30 = vsel %vm176_vm0, %v168_v21, 0.0  ;;  %v170_v31 = vmul.f32 %v139_v22, %v72_v18  ;;  %v169_v32 = vmul.f32 %v135_v23, %v71_v19  ;;  %v143_v33 = vrot.slane %v126_v24, %v613_v8  ;;  %v209_v18 = vld [vmem:[#allocation8] sm:$0xff] }
  0x43   :  { %178 = vadd.xlane.f32.xlu0 %v177_v30  ;;  %v173_v44 = vmul.f32 %v151_v36, %v75_v35  ;;  %v159_v45 = vrot.slane %v127_v37, %v613_v8  ;;  %v189_v47 = vsel %vm176_vm0, %v172_v34, 0.0  ;;  %v174_v48 = vmul.f32 %v155_v41, %v76_v42 }
  0x44   :  { %v183_v38 = vsel %vm176_vm0, %v170_v31, 0.0  ;;  %v180_v39 = vsel %vm176_vm0, %v169_v32, 0.0  ;;  %v171_v40 = vmul.f32 %v143_v33, %v73_v26  ;;  %vm210_vm8 = vcmp.ne.s32.totalorder %v209_v18, 0 }
  0x45   :  { %184 = vadd.xlane.f32.xlu1 %v183_v38  ;;  %v192_v49 = vsel %vm176_vm0, %v173_v44, 0.0  ;;  %v175_v50 = vmul.f32 %v159_v45, %v77_v46  ;;  %v195_v51 = vsel %vm176_vm0, %v174_v48, 0.0  ;;  %v298_v33 = vsub.s32 1, %v609_v3 }
  0x46   :  { %v186_v43 = vsel %vm176_vm0, %v171_v40, 0.0  ;;  %v305_v38 = vsub.s32 2, %v609_v3  ;;  %v312_v42 = vsub.s32 3, %v609_v3  ;;  %v326_v46 = vsub.s32 5, %v609_v3 }
  0x47   :  { %181 = vadd.xlane.f32.xlu0 %v180_v39  ;;  %v198_v52 = vsel %vm176_vm0, %v175_v50, 0.0  ;;  %v319_v39 = vsub.s32 4, %v609_v3  ;;  %v281_v50 = vld [vmem:[#allocation7] sm:$0xff] }
  0x49   :  { %187 = vadd.xlane.f32.xlu1 %v186_v43  ;;  %v333_v43 = vsub.s32 6, %v609_v3 }
  0x4b   :  { %190 = vadd.xlane.f32.xlu0 %v189_v47  ;;  %v340_v47 = vsub.s32 7, %v609_v3 }
  0x4d   :  { %193 = vadd.xlane.f32.xlu1 %v192_v49  ;;  %v282_v49 = vld [vmem:[#allocation7 + $0x8] sm:$0xff] }
  0x4f   :  { %196 = vadd.xlane.f32.xlu0 %v195_v51 }
  0x51   :  { %199 = vadd.xlane.f32.xlu1 %v198_v52 }
  0xcc   :  { %v179_v54 = vpop.xlane.xlu0 %178 }
  0xcd   :  { %v201_v57 = vmul.f32 0.17677669, %v179_v54 }
  0xce   :  { %v185_v55 = vpop.xlane.xlu1 %184 }
  0xcf   :  { %v203_v58 = vmul.f32 0.17677669, %v185_v55  ;;  %v224_v62 = vrot.slane %v201_v57, %v223_v56  ;;  %v283_v55 = vld [vmem:[#allocation7 + $0x10] sm:$0xff] }
  0xd0   :  { %v182_v59 = vpop.xlane.xlu0 %181 }
  0xd1   :  { %v202_v60 = vmul.f32 0.17677669, %v182_v59  ;;  %v232_v2 = vrot.slane %v203_v58, %v223_v56 }
  0xd2   :  { %v188_v61 = vpop.xlane.xlu1 %187 }
  0xd3   :  { %v228_v63 = vrot.slane %v202_v60, %v223_v56  ;;  %v204_v1 = vmul.f32 0.17677669, %v188_v61 }
  0xd4   :  { %v191_v4 = vpop.xlane.xlu0 %190 }
  0xd5   :  { %v254_v5 = vsel %vm253_vm1, %v228_v63, %v224_v62  ;;  %v236_v0 = vrot.slane %v204_v1, %v223_v56  ;;  %v205_v6 = vmul.f32 0.17677669, %v191_v4  ;;  %v284_v4 = vld [vmem:[#allocation7 + $0x18] sm:$0xff] }
  0xd6   :  { %v256_v7 = vsel %vm255_vm2, %v232_v2, %v254_v5  ;;  %v194_v9 = vpop.xlane.xlu1 %193  ;;  %v287_v5 = vld [vmem:[#allocation7 + $0x30] sm:$0xff] }
  0xd7   :  { %v258_v10 = vsel %vm257_vm3, %v236_v0, %v256_v7  ;;  %v240_v11 = vrot.slane %v205_v6, %v223_v56  ;;  %v206_v12 = vmul.f32 0.17677669, %v194_v9 }
  0xd8   :  { %v197_v13 = vpop.xlane.xlu0 %196 }
  0xd9   :  { %v260_v14 = vsel %vm259_vm4, %v240_v11, %v258_v10  ;;  %v244_v15 = vrot.slane %v206_v12, %v223_v56  ;;  %v207_v16 = vmul.f32 0.17677669, %v197_v13 }
  0xda   :  { %v200_v17 = vpop.xlane.xlu1 %199 }
  0xdb   :  { %v248_v19 = vrot.slane %v207_v16, %v223_v56  ;;  %v208_v20 = vmul.f32 0.17677669, %v200_v17  ;;  %v262_v21 = vsel %vm261_vm5, %v244_v15, %v260_v14 }
  0xdd   :  { %v252_v22 = vrot.slane %v208_v20, %v223_v56  ;;  %v264_v23 = vsel %vm263_vm6, %v248_v19, %v262_v21  ;;  %v285_v56 = vld [vmem:[#allocation7 + $0x20] sm:$0xff]  ;;  %v286_v19 = vld [vmem:[#allocation7 + $0x28] sm:$0xff] }
  0xdf   :  { %v266_v24 = vsel %vm265_vm7, %v252_v22, %v264_v23 }
  0xe0   :  { %v268_v25 = vsel %vm210_vm8, -1e+09, %v266_v24 }
  0xe1   :  { %v270_v26 = vsel %vm269_vm9, %v268_v25, -inf }
  0xe2   :  { %271 = vmax.xlane.f32.xlu0 %v270_v26 }
 0x16b   :  { %v272_v27 = vpop.xlane.xlu0 %271 }
 0x16c   :  { %v273_v28 = vsub.f32 %v268_v25, %v272_v27 }
 0x16e   :  { %v274_v29 = vmul.f32 1.442695, %v273_v28 }
 0x170   :  { %452 = vpow2.f32 %v274_v29 }
 0x17d   :  { %v453_v30 = vpop.eup %452 }
 0x17e   :  { %v276_v31 = vsel %vm269_vm9, %v453_v30, 0.0 }
 0x17f   :  { %277 = vadd.xlane.f32.xlu1 %v276_v31  ;;  %v288_v31 = vld [vmem:[#allocation7 + $0x38] sm:$0xff] }
 0x208   :  { %v278_v32 = vpop.xlane.xlu1 %277 }
 0x209   :  { %454 = vrcp.f32 %v278_v32 }
 0x216   :  { %v455_v34 = vpop.eup %454 }
 0x217   :  { %v280_v35 = vmul.f32 %v455_v34, %v453_v30 }
 0x219   :  { %v299_v36 = vrot.slane %v280_v35, %v298_v33  ;;  %v292_v37 = vrot.slane %v280_v35, %v613_v8  ;;  %v306_v40 = vrot.slane %v280_v35, %v305_v38  ;;  %v320_v41 = vrot.slane %v280_v35, %v319_v39 }
 0x21a   :  { %v313_v44 = vrot.slane %v280_v35, %v312_v42  ;;  %v334_v45 = vrot.slane %v280_v35, %v333_v43  ;;  %v327_v8 = vrot.slane %v280_v35, %v326_v46  ;;  %v341_v48 = vrot.slane %v280_v35, %v340_v47 }
 0x21b   :  { %301 = vbcast.lane.b32.xlu1 %v299_v36, 256  ;;  %294 = vbcast.lane.b32.xlu0 %v292_v37, 256 }
 0x21f   :  { %308 = vbcast.lane.b32.xlu1 %v306_v40, 256  ;;  %322 = vbcast.lane.b32.xlu0 %v320_v41, 256 }
 0x223   :  { %315 = vbcast.lane.b32.xlu1 %v313_v44, 256  ;;  %336 = vbcast.lane.b32.xlu0 %v334_v45, 256 }
 0x227   :  { %329 = vbcast.lane.b32.xlu1 %v327_v8, 256 }
 0x22b   :  { %343 = vbcast.lane.b32.xlu1 %v341_v48, 256 }
 0x28d   :  { %v302_v51 = vpop.permute.xlu1 %301  ;;  %v295_v52 = vpop.permute.xlu0 %294 }
 0x28e   :  { %v346_v53 = vmul.f32 %v302_v51, %v282_v49  ;;  %v345_v54 = vmul.f32 %v295_v52, %v281_v50 }
 0x290   :  { %v360_v57 = vsel %vm176_vm0, %v346_v53, 0.0  ;;  %v353_v58 = vsel %vm176_vm0, %v345_v54, 0.0 }
 0x291   :  { %v361_v59 = vrot.slane %v360_v57, 4  ;;  %v354_v60 = vrot.slane %v353_v58, 4  ;;  %v309_v61 = vpop.permute.xlu1 %308  ;;  %v323_v62 = vpop.permute.xlu0 %322 }
 0x292   :  { %v347_v3 = vmul.f32 %v309_v61, %v283_v55  ;;  %v349_v63 = vmul.f32 %v323_v62, %v285_v56 }
 0x293   :  { %v362_v1 = vadd.f32 %v361_v59, %v360_v57  ;;  %v355_v2 = vadd.f32 %v354_v60, %v353_v58 }
 0x294   :  { %v367_v0 = vsel %vm176_vm0, %v347_v3, 0.0  ;;  %v381_v6 = vsel %vm176_vm0, %v349_v63, 0.0 }
 0x295   :  { %v363_v7 = vrot.slane %v362_v1, 2  ;;  %v356_v9 = vrot.slane %v355_v2, 2  ;;  %v368_v10 = vrot.slane %v367_v0, 4  ;;  %v382_v11 = vrot.slane %v381_v6, 4  ;;  %v316_v12 = vpop.permute.xlu1 %315  ;;  %v337_v13 = vpop.permute.xlu0 %336 }
 0x296   :  { %v348_v14 = vmul.f32 %v316_v12, %v284_v4  ;;  %v351_v15 = vmul.f32 %v337_v13, %v287_v5 }
 0x297   :  { %v364_v16 = vadd.f32 %v363_v7, %v362_v1  ;;  %v369_v17 = vadd.f32 %v368_v10, %v367_v0  ;;  %v383_v18 = vadd.f32 %v382_v11, %v381_v6  ;;  %v357_v20 = vadd.f32 %v356_v9, %v355_v2 }
 0x298   :  { %v374_v21 = vsel %vm176_vm0, %v348_v14, 0.0  ;;  %v395_v22 = vsel %vm176_vm0, %v351_v15, 0.0 }
 0x299   :  { %v370_v23 = vrot.slane %v369_v17, 2  ;;  %v330_v24 = vpop.permute.xlu1 %329  ;;  %v384_v25 = vrot.slane %v383_v18, 2  ;;  %v375_v26 = vrot.slane %v374_v21, 4  ;;  %v396_v27 = vrot.slane %v395_v22, 4 }
 0x29a   :  { %v350_v28 = vmul.f32 %v330_v24, %v286_v19  ;;  %v365_v29 = vrot.slane %v364_v16, 1  ;;  %v358_v32 = vrot.slane %v357_v20, 1 }
 0x29b   :  { %v371_v30 = vadd.f32 %v370_v23, %v369_v17  ;;  %v376_v33 = vadd.f32 %v375_v26, %v374_v21  ;;  %v397_v34 = vadd.f32 %v396_v27, %v395_v22  ;;  %v385_v39 = vadd.f32 %v384_v25, %v383_v18 }
 0x29c   :  { %v388_v35 = vsel %vm176_vm0, %v350_v28, 0.0  ;;  %v366_v44 = vadd.f32 %v365_v29, %v364_v16  ;;  %v359_v45 = vadd.f32 %v358_v32, %v357_v20 }
 0x29d   :  { %v372_v36 = vrot.slane %v371_v30, 1  ;;  %v389_v37 = vrot.slane %v388_v35, 4  ;;  %v344_v38 = vpop.permute.xlu1 %343  ;;  %v377_v40 = vrot.slane %v376_v33, 2  ;;  %v398_v41 = vrot.slane %v397_v34, 2 }
 0x29e   :  { %v352_v42 = vmul.f32 %v344_v38, %v288_v31  ;;  %v386_v50 = vrot.slane %v385_v39, 1  ;;  %v417_v55 = vsel %vm253_vm1, %v366_v44, %v359_v45 }
 0x29f   :  { %v390_v43 = vadd.f32 %v389_v37, %v388_v35  ;;  %v378_v46 = vadd.f32 %v377_v40, %v376_v33  ;;  %v373_v47 = vadd.f32 %v372_v36, %v371_v30  ;;  %v399_v52 = vadd.f32 %v398_v41, %v397_v34 }
 0x2a0   :  { %v402_v8 = vsel %vm176_vm0, %v352_v42, 0.0  ;;  %v387_v60 = vadd.f32 %v386_v50, %v385_v39 }
 0x2a1   :  { %v391_v48 = vrot.slane %v390_v43, 2  ;;  %v403_v49 = vrot.slane %v402_v8, 4  ;;  %v379_v51 = vrot.slane %v378_v46, 1  ;;  %v418_v57 = vsel %vm255_vm2, %v373_v47, %v417_v55 }
 0x2a2   :  { %v400_v62 = vrot.slane %v399_v52, 1 }
 0x2a3   :  { %v392_v53 = vadd.f32 %v391_v48, %v390_v43  ;;  %v404_v54 = vadd.f32 %v403_v49, %v402_v8  ;;  %v380_v56 = vadd.f32 %v379_v51, %v378_v46 }
 0x2a4   :  { %v401_v5 = vadd.f32 %v400_v62, %v399_v52 }
 0x2a5   :  { %v393_v58 = vrot.slane %v392_v53, 1  ;;  %v405_v59 = vrot.slane %v404_v54, 2  ;;  %v419_v61 = vsel %vm257_vm3, %v380_v56, %v418_v57 }
 0x2a6   :  { %v420_v1 = vsel %vm259_vm4, %v387_v60, %v419_v61 }
 0x2a7   :  { %v394_v3 = vadd.f32 %v393_v58, %v392_v53  ;;  %v406_v63 = vadd.f32 %v405_v59, %v404_v54 }
 0x2a9   :  { %v407_v2 = vrot.slane %v406_v63, 1  ;;  %v421_v4 = vsel %vm261_vm5, %v394_v3, %v420_v1 }
 0x2aa   :  { %v422_v6 = vsel %vm263_vm6, %v401_v5, %v421_v4 }
 0x2ab   :  { %v408_v0 = vadd.f32 %v407_v2, %v406_v63 }
 0x2ad   :  { %v423_v7 = vsel %vm265_vm7, %v408_v0, %v422_v6 }
 0x2ae   :  { %425 = vst.msk [vmem:[#allocation10] sm:$0xff] %vm176_vm0, %v423_v7 }
 0x2af   :  { %547 = shalt.err (!%p544_p10)
}
 0x2b0   :  { %435 = dma.vmem_to_hbm [thread:$0]  %s433_s3, 128, %s670_s4, [#allocation4]  }
 0x2b1   :  { %562 = dma.done.wait [#allocation4], 128  }
 0x2b2   :  { %563 = vsyncadd [#allocation4], 4294967168 }
 0x2b3   :  { %439 = vsyncpa [#allocation3], 1 }
 0x2b4   :  { %440 = vsyncpa [#allocation6], 1 }
 0x2b5   :  { %441 = vsyncpa [#allocation9], 1 }
 0x2b6   :  { %442 = vsyncpa [#allocation4], 1 }

</bundles_post_ra>
